<compile_context>
chip_gen: v5e
topology: v5e:2x2
jax: 0.10.0
libtpu: 0.0.40
codegen_flags: <defaults>
</compile_context>

<pallas_src>
import functools

import jax
import jax.numpy as jnp
from jax import lax
from jax.experimental import pallas as pl
from jax.experimental.pallas import tpu as pltpu


PARAM_ORDER = ["wx", "bx", "wqkv", "wo", "w1", "b1", "w2", "b2"]

NEG_INF = -1e9


def _round_up(x, m):
    return ((x + m - 1) // m) * m


def discriminator_kernel(
    x_ref, ebias_ref, poolw_ref,
    wx_ref, bx_ref, wqkv_ref, wo_ref, w1_ref, b1_ref, w2_ref, b2_ref,
    out_ref, *, hidden_true, packed,
):
    f32 = jnp.float32
    Bt, N, DX = x_ref.shape
    Hp = wx_ref.shape[1]
    cdt = wqkv_ref.dtype                      # matmul operand dtype (bf16 by default)
    R = Bt * N                                # N is padded to a multiple of 8 in the wrapper,
                                              # so (Bt, N, .) -> (R, .) reshapes are free relabels

    # ----- node embedding: one (R, DX) @ (DX, Hp) GEMM for the whole block -----
    x = x_ref[...].reshape(R, DX)
    h = jnp.dot(x, wx_ref[...], preferred_element_type=f32) + bx_ref[...].astype(f32)

    # ----- fused Q/K/V projection: one (R, Hp) @ (Hp, 3Hp) GEMM; slices go straight to bf16 -----
    scale = 1.0 / float(hidden_true) ** 0.5
    qkv = jnp.dot(h.astype(cdt), wqkv_ref[...], preferred_element_type=f32)
    q = (qkv[:, :Hp] * scale).astype(cdt)
    k = qkv[:, Hp:2 * Hp].astype(cdt)
    v = qkv[:, 2 * Hp:].astype(cdt)

    if packed:
        # Packed attention over all Bt graphs in the block: a single (R, Hp+N+Bt) GEMM
        # produces q.k^T, the per-edge bias, and the cross-graph -1e9 mask in one MXU pass
        # (bias / mask ride through extra columns appended to q and k), so the softmax and
        # the PV matmul run over R = Bt*N lanes instead of N lanes.
        ebias2 = ebias_ref[...].reshape(R, N)                       # key mask already folded in
        key_sel = (lax.broadcasted_iota(jnp.int32, (Bt, N, N), 1) ==
                   lax.broadcasted_iota(jnp.int32, (Bt, N, N), 2)
                   ).reshape(R, N).astype(cdt)                      # one-hot within-graph key id
        same_g = (lax.broadcasted_iota(jnp.int32, (Bt, N, Bt), 0) ==
                  lax.broadcasted_iota(jnp.int32, (Bt, N, Bt), 2)
                  ).reshape(R, Bt)                                  # one-hot own graph id
        neg_other = jnp.where(same_g, 0.0, NEG_INF).astype(cdt)     # 0 same-graph / -1e9 other

        q_aug = jnp.concatenate([q, ebias2, neg_other], axis=1)            # (R, Hp+N+Bt)
        k_aug = jnp.concatenate([k, key_sel, same_g.astype(cdt)], axis=1)  # (R, Hp+N+Bt)
        scores = lax.dot_general(q_aug, k_aug, (((1,), (1,)), ((), ())),
                                 preferred_element_type=f32)               # (R, R)
        m = jnp.max(scores, axis=-1, keepdims=True)
        p = jnp.exp(scores - m)
        att = p * pl.reciprocal(jnp.sum(p, axis=-1, keepdims=True), approx=True)
        att_out = jnp.dot(att.astype(cdt), v, preferred_element_type=f32)  # (R, Hp)
    else:
        # Large-N fallback: batched per-graph attention with the precomputed edge bias.
        q3 = q.reshape(Bt, N, Hp)
        k3 = k.reshape(Bt, N, Hp)
        v3 = v.reshape(Bt, N, Hp)
        scores = jnp.einsum("bnh,bmh->bnm", q3, k3, preferred_element_type=f32)
        scores = scores + ebias_ref[...].astype(f32)
        m = jnp.max(scores, axis=-1, keepdims=True)
        p = jnp.exp(scores - m)
        att = p * pl.reciprocal(jnp.sum(p, axis=-1, keepdims=True), approx=True)
        att_out = jnp.einsum("bnm,bmh->bnh", att.astype(cdt), v3,
                             preferred_element_type=f32).reshape(R, Hp)

    h = h + jnp.dot(att_out.astype(cdt), wo_ref[...], preferred_element_type=f32)

    # ----- feed-forward block -----
    ffn = jnp.maximum(
        jnp.dot(h.astype(cdt), w1_ref[...], preferred_element_type=f32)
        + b1_ref[...].astype(f32), 0.0)
    h = h + jnp.dot(ffn.astype(cdt), w2_ref[...], preferred_element_type=f32) \
          + b2_ref[...].astype(f32)                                         # (R, Hp) f32

    # ----- masked mean pooling per graph (exact: divide precomputed in poolw) -----
    poolw = poolw_ref[0]                                           # (Bt, N) f32 = mask / n_nodes
    g = jnp.sum(h.reshape(Bt, N, Hp) * poolw[:, :, None], axis=1)  # (Bt, Hp)
    out_ref[0] = g.astype(out_ref.dtype)                           # lane-dense store


def _working_set_bytes(Bt, N, dx, Hp, FFp, esz, packed):
    """Trace-time estimate of the per-grid-step VMEM footprint (inputs are double-buffered)."""
    R = Bt * N
    w_elems = dx * Hp + Hp + Hp * 3 * Hp + Hp * Hp + Hp * FFp + FFp + FFp * Hp + Hp
    data = 2 * (R * dx * esz + Bt * N * N * esz + Bt * N * 4) + 2 * Bt * Hp * 4
    weights = 2 * w_elems * esz
    inter = (2 * R * Hp * 4          # h, att_out (f32)
             + R * 3 * Hp * 4        # fused qkv (f32)
             + 3 * R * Hp * esz      # q, k, v (bf16)
             + R * FFp * 4)          # ffn (f32)
    if packed:
        aug = Hp + N + Bt
        inter += 2 * R * aug * esz + 3 * R * R * 4       # q_aug/k_aug + scores/p/att
    else:
        inter += 3 * Bt * N * N * 4
    return data + weights + inter


def make_params(key, dx1, de1, dy, hidden, ff):
    ks = jax.random.split(key, 16)
    s = 0.1
    return {
        "wx": s * jax.random.normal(ks[0], (dx1, hidden), jnp.float32),
        "bx": s * jax.random.normal(ks[1], (1, hidden), jnp.float32),
        "wy": s * jax.random.normal(ks[2], (dy, hidden), jnp.float32),
        "webias": s * jax.random.normal(ks[3], (1, de1), jnp.float32),
        "wq": s * jax.random.normal(ks[4], (hidden, hidden), jnp.float32),
        "wk": s * jax.random.normal(ks[5], (hidden, hidden), jnp.float32),
        "wv": s * jax.random.normal(ks[6], (hidden, hidden), jnp.float32),
        "wo": s * jax.random.normal(ks[7], (hidden, hidden), jnp.float32),
        "w1": s * jax.random.normal(ks[8], (hidden, ff), jnp.float32),
        "b1": s * jax.random.normal(ks[9], (1, ff), jnp.float32),
        "w2": s * jax.random.normal(ks[10], (ff, hidden), jnp.float32),
        "b2": s * jax.random.normal(ks[11], (1, hidden), jnp.float32),
        "wout": s * jax.random.normal(ks[12], (hidden, 1), jnp.float32),
        "bout": s * jax.random.normal(ks[13], (1, 1), jnp.float32),
    }


@functools.partial(jax.jit, static_argnames=("node_output_dim", "edge_output_dim",
                                             "block_graphs", "compute_dtype"))
def discriminator_forward(X_raw, E_raw, node_mask, params,
                          node_output_dim, edge_output_dim,
                          block_graphs=None, compute_dtype=jnp.bfloat16):
    """Discriminator.forward on a dense graph batch.

    X_raw:     (B, N, DX_raw)     dense node features
    E_raw:     (B, N, N, DE_raw)  dense edge features
    node_mask: (B, N)             float {0,1}
    returns:   (B, 1)             discriminator logits
    """
    f32 = jnp.float32
    B, N0, _ = X_raw.shape
    dx = node_output_dim
    de = edge_output_dim
    hidden = params["wq"].shape[0]
    ff = params["w1"].shape[1]
    Hp = _round_up(hidden, 128)               # lane-align every GEMM / store
    FFp = _round_up(ff, 128)
    esz = jnp.dtype(compute_dtype).itemsize

    # Pad the node axis to a sublane multiple so in-kernel (Bt*N, .) flattens are pure relabels.
    N = _round_up(N0, 8)
    if N != N0:
        X_raw = jnp.pad(X_raw, ((0, 0), (0, N - N0), (0, 0)))
        E_raw = jnp.pad(E_raw, ((0, 0), (0, N - N0), (0, N - N0), (0, 0)))
        node_mask = jnp.pad(node_mask, ((0, 0), (0, N - N0)))
    mask_f = node_mask.astype(f32)                                    # (B, N)

    # ----- generation-aware VMEM budget (v7x: 64 MiB / TC; v5e & v6e: 128 MiB) -----
    try:
        cap = int(getattr(pltpu.get_tpu_info(), "vmem_capacity_bytes", 128 * 1024 * 1024))
    except Exception:
        cap = 128 * 1024 * 1024
    if cap <= 64 * 1024 * 1024:
        ws_budget, vmem_limit = 40 * 1024 * 1024, 56 * 1024 * 1024    # v7x
    else:
        ws_budget, vmem_limit = 64 * 1024 * 1024, 100 * 1024 * 1024   # v5e / v6e

    # ----- pick Bt (graphs per grid step) from the true working set -----
    packed_attn = N <= 64
    if block_graphs is not None:
        Bt_cap = max(1, min(int(block_graphs), B))
    else:
        Bt_cap = B if B <= 1 else max(1, (B + 1) // 2)   # >=2 grid steps so v7x's 2 TCs both work
    if packed_attn:
        Bt_cap = min(Bt_cap, max(1, 512 // N))           # cap packed score matrix at 512x512
    Bt_cap = max(1, min(Bt_cap, 1024))
    Bt = 1
    for cand in range(Bt_cap, 0, -1):
        if _working_set_bytes(cand, N, dx, Hp, FFp, esz, packed_attn) <= ws_budget:
            Bt = cand
            break
    num_blocks = pl.cdiv(B, Bt)
    B_pad = num_blocks * Bt

    # _add_dimension: the appended virtual channel on X / E is zero, so it contributes nothing
    # to X @ wx / E . webias — slice the weights instead of concatenating zeros into HBM.
    X = X_raw[..., :dx].astype(f32) * mask_f[:, :, None]              # PlaceHolder.mask on X
    webias = params["webias"].astype(compute_dtype).reshape(-1)[:de]

    # Collapse E -> scalar, key-masked attention bias outside the kernel (cuts kernel DMA by
    # (DE+1)x); E is read in bf16 to limit the extra HBM pass on bandwidth-limited v5e.
    ebias = jnp.einsum("bnmd,d->bnm", E_raw[..., :de].astype(compute_dtype), webias,
                       preferred_element_type=f32)
    ebias = jnp.where(mask_f[:, None, :] > 0.0, ebias, jnp.float32(NEG_INF))

    # Exact masked-mean pooling weights (mask / n_nodes): keeps the pooling divide exact and
    # removes the lane-1 mask stream from the kernel.
    cnt = jnp.maximum(jnp.sum(mask_f, axis=1, keepdims=True), 1.0)
    poolw = mask_f / cnt                                              # (B, N) f32

    # TODO(synk): get_noisy_data (stochastic diffusion forward noising) is graph-kernel specific
    # and has no reference implementation here; the masked data is used directly.

    if B_pad != B:
        X = jnp.pad(X, ((0, B_pad - B), (0, 0), (0, 0)))
        ebias = jnp.pad(ebias, ((0, B_pad - B), (0, 0), (0, 0)))
        poolw = jnp.pad(poolw, ((0, B_pad - B), (0, 0)))

    X = X.astype(compute_dtype)
    ebias = ebias.astype(compute_dtype)
    poolw = poolw.reshape(num_blocks, Bt, N)

    # ----- weights: drop zero virtual-channel row, pad H/FF to 128 multiples, fuse Q|K|V -----
    def pad2(a, r, c):
        return jnp.pad(a, ((0, r - a.shape[0]), (0, c - a.shape[1])))

    wq = pad2(params["wq"], Hp, Hp)
    wk = pad2(params["wk"], Hp, Hp)
    wv = pad2(params["wv"], Hp, Hp)
    p = {
        "wx": pad2(params["wx"][:dx], dx, Hp),
        "bx": pad2(params["bx"], 1, Hp),
        "wqkv": jnp.concatenate([wq, wk, wv], axis=1),
        "wo": pad2(params["wo"], Hp, Hp),
        "w1": pad2(params["w1"], Hp, FFp),
        "b1": pad2(params["b1"], 1, FFp),
        "w2": pad2(params["w2"], FFp, Hp),
        "b2": pad2(params["b2"], 1, Hp),
    }
    p = {k: v.astype(compute_dtype) for k, v in p.items()}

    data_map = lambda b: (b, 0, 0)
    param_map = lambda b: (0, 0)

    in_specs = [
        pl.BlockSpec((Bt, N, dx), data_map),     # node features
        pl.BlockSpec((Bt, N, N), data_map),      # precomputed, key-masked edge bias
        pl.BlockSpec((1, Bt, N), data_map),      # exact pooling weights (mask / n_nodes)
    ] + [pl.BlockSpec(p[k].shape, param_map) for k in PARAM_ORDER]

    kernel = functools.partial(discriminator_kernel,
                               hidden_true=hidden, packed=packed_attn)

    g = pl.pallas_call(
        kernel,
        out_shape=jax.ShapeDtypeStruct((num_blocks, Bt, Hp), f32),
        grid=(num_blocks,),
        in_specs=in_specs,
        out_specs=pl.BlockSpec((1, Bt, Hp), data_map),   # lane-dense pooled graph embeddings
        compiler_params=pltpu.CompilerParams(
            dimension_semantics=("parallel",),
            vmem_limit_bytes=vmem_limit),
    )(X, ebias, poolw, *[p[k] for k in PARAM_ORDER])

    # Tiny H->1 readout stays in XLA so the kernel's output store is lane-dense and the MXU
    # never runs a 1-column matmul.
    # TODO(synk): y-conditioning (g += y @ wy) skipped — y is identically zero in
    # _add_dimension until get_noisy_data populates it.
    wout = jnp.pad(params["wout"].astype(f32),
                   ((0, Hp - params["wout"].shape[0]), (0, 0)))
    logits = g.reshape(B_pad, Hp)[:B] @ wout + params["bout"].astype(f32)
    return logits


if __name__ == "__main__":
    # Small shapes consistent with the module's forward.
    B, N = 2, 8
    DX_RAW, DE_RAW = 6, 3          # raw dense feature dims
    NODE_OUT_DIM, EDGE_OUT_DIM = 4, 3
    HIDDEN, FF, DY = 32, 64, 1

    key = jax.random.PRNGKey(0)
    k_x, k_e, k_p = jax.random.split(key, 3)

    X_raw = jax.random.normal(k_x, (B, N, DX_RAW), jnp.float32)
    E_raw = jax.random.normal(k_e, (B, N, N, DE_RAW), jnp.float32)
    # graphs with 8 and 5 real nodes
    n_nodes = jnp.array([8, 5], jnp.int32)
    node_mask = (jnp.arange(N)[None, :] < n_nodes[:, None]).astype(jnp.float32)

    params = make_params(k_p, NODE_OUT_DIM + 1, EDGE_OUT_DIM + 1, DY, HIDDEN, FF)

    logits = discriminator_forward(
        X_raw, E_raw, node_mask, params,
        node_output_dim=NODE_OUT_DIM, edge_output_dim=EDGE_OUT_DIM)
    logits = jax.block_until_ready(logits)

    assert logits.shape == (B, 1)
    assert bool(jnp.all(jnp.isfinite(logits)))
    print("KERNEL_OK")
</pallas_src>

<mosaic_0001>
module attributes {stable_mosaic.version = 11 : i64} {
  func.func @discriminator_kernel(%arg0: i32, %arg1: memref<1x8x4xbf16, #tpu.memory_space<vmem>>, %arg2: memref<1x8x8xbf16, #tpu.memory_space<vmem>>, %arg3: memref<1x1x8xf32, #tpu.memory_space<vmem>>, %arg4: memref<4x128xbf16, #tpu.memory_space<vmem>>, %arg5: memref<1x128xbf16, #tpu.memory_space<vmem>>, %arg6: memref<128x384xbf16, #tpu.memory_space<vmem>>, %arg7: memref<128x128xbf16, #tpu.memory_space<vmem>>, %arg8: memref<128x128xbf16, #tpu.memory_space<vmem>>, %arg9: memref<1x128xbf16, #tpu.memory_space<vmem>>, %arg10: memref<128x128xbf16, #tpu.memory_space<vmem>>, %arg11: memref<1x128xbf16, #tpu.memory_space<vmem>>, %arg12: memref<1x1x128xf32, #tpu.memory_space<vmem>>) attributes {dimension_semantics = [#tpu.dimension_semantics<parallel>], iteration_bounds = array<i64: 2>, scalar_prefetch = 0 : i64, scratch_operands = 0 : i64, tpu.core_type = #tpu.core_type<tc>, window_params = [{transform_indices = @transform_0, window_bounds = array<i64: 1, 8, 4>}, {transform_indices = @transform_1, window_bounds = array<i64: 1, 8, 8>}, {transform_indices = @transform_2, window_bounds = array<i64: 1, 1, 8>}, {pipeline_mode = #tpu.pipeline_mode<synchronous>, transform_indices = @transform_3, window_bounds = array<i64: 4, 128>}, {pipeline_mode = #tpu.pipeline_mode<synchronous>, transform_indices = @transform_4, window_bounds = array<i64: 1, 128>}, {pipeline_mode = #tpu.pipeline_mode<synchronous>, transform_indices = @transform_5, window_bounds = array<i64: 128, 384>}, {pipeline_mode = #tpu.pipeline_mode<synchronous>, transform_indices = @transform_6, window_bounds = array<i64: 128, 128>}, {pipeline_mode = #tpu.pipeline_mode<synchronous>, transform_indices = @transform_7, window_bounds = array<i64: 128, 128>}, {pipeline_mode = #tpu.pipeline_mode<synchronous>, transform_indices = @transform_8, window_bounds = array<i64: 1, 128>}, {pipeline_mode = #tpu.pipeline_mode<synchronous>, transform_indices = @transform_9, window_bounds = array<i64: 128, 128>}, {pipeline_mode = #tpu.pipeline_mode<synchronous>, transform_indices = @transform_10, window_bounds = array<i64: 1, 128>}, {transform_indices = @transform_11, window_bounds = array<i64: 1, 1, 128>}]} {
    %c0 = arith.constant 0 : index
    %c0_0 = arith.constant 0 : index
    %c0_1 = arith.constant 0 : index
    %0 = vector.load %arg1[%c0, %c0_0, %c0_1] : memref<1x8x4xbf16, #tpu.memory_space<vmem>>, vector<1x8x4xbf16>
    %1 = vector.shape_cast %0 : vector<1x8x4xbf16> to vector<8x4xbf16>
    %c0_2 = arith.constant 0 : index
    %c0_3 = arith.constant 0 : index
    %2 = vector.load %arg4[%c0_2, %c0_3] : memref<4x128xbf16, #tpu.memory_space<vmem>>, vector<4x128xbf16>
    %cst = arith.constant dense<0.000000e+00> : vector<8x128xf32>
    %3 = tpu.matmul %1, %2, %cst {dimension_numbers = #tpu.dot_dimension_numbers<[1], [0], [0], [1], [0, 0, 1, 1], [], []>} : vector<8x4xbf16>, vector<4x128xbf16>, vector<8x128xf32> -> vector<8x128xf32>
    %c0_4 = arith.constant 0 : index
    %c0_5 = arith.constant 0 : index
    %4 = vector.load %arg5[%c0_4, %c0_5] : memref<1x128xbf16, #tpu.memory_space<vmem>>, vector<1x128xbf16>
    %5 = arith.extf %4 : vector<1x128xbf16> to vector<1x128xf32>
    %6 = vector.broadcast %5 : vector<1x128xf32> to vector<8x128xf32>
    %7 = arith.addf %3, %6 : vector<8x128xf32>
    %8 = arith.truncf %7 : vector<8x128xf32> to vector<8x128xbf16>
    %c0_6 = arith.constant 0 : index
    %c0_7 = arith.constant 0 : index
    %9 = vector.load %arg6[%c0_6, %c0_7] : memref<128x384xbf16, #tpu.memory_space<vmem>>, vector<128x384xbf16>
    %cst_8 = arith.constant dense<0.000000e+00> : vector<8x384xf32>
    %10 = tpu.matmul %8, %9, %cst_8 {dimension_numbers = #tpu.dot_dimension_numbers<[1], [0], [0], [1], [0, 0, 1, 1], [], []>} : vector<8x128xbf16>, vector<128x384xbf16>, vector<8x384xf32> -> vector<8x384xf32>
    %11 = vector.extract_strided_slice %10 {offsets = [0, 0], sizes = [8, 128], strides = [1, 1]} : vector<8x384xf32> to vector<8x128xf32>
    %cst_9 = arith.constant 0.176776692 : f32
    %12 = vector.broadcast %cst_9 : f32 to vector<8x128xf32>
    %13 = arith.mulf %11, %12 : vector<8x128xf32>
    %14 = arith.truncf %13 : vector<8x128xf32> to vector<8x128xbf16>
    %15 = vector.extract_strided_slice %10 {offsets = [0, 128], sizes = [8, 128], strides = [1, 1]} : vector<8x384xf32> to vector<8x128xf32>
    %16 = arith.truncf %15 : vector<8x128xf32> to vector<8x128xbf16>
    %17 = vector.extract_strided_slice %10 {offsets = [0, 256], sizes = [8, 128], strides = [1, 1]} : vector<8x384xf32> to vector<8x128xf32>
    %18 = arith.truncf %17 : vector<8x128xf32> to vector<8x128xbf16>
    %c0_10 = arith.constant 0 : index
    %c0_11 = arith.constant 0 : index
    %c0_12 = arith.constant 0 : index
    %19 = vector.load %arg2[%c0_10, %c0_11, %c0_12] : memref<1x8x8xbf16, #tpu.memory_space<vmem>>, vector<1x8x8xbf16>
    %20 = vector.shape_cast %19 : vector<1x8x8xbf16> to vector<8x8xbf16>
    %21 = tpu.iota {dimensions = array<i32: 1>} : vector<1x8x8xi32>
    %22 = tpu.iota {dimensions = array<i32: 2>} : vector<1x8x8xi32>
    %23 = arith.cmpi eq, %21, %22 : vector<1x8x8xi32>
    %24 = vector.shape_cast %23 : vector<1x8x8xi1> to vector<8x8xi1>
    %25 = arith.extui %24 : vector<8x8xi1> to vector<8x8xi32>
    %26 = arith.sitofp %25 : vector<8x8xi32> to vector<8x8xf32>
    %27 = arith.truncf %26 : vector<8x8xf32> to vector<8x8xbf16>
    %28 = tpu.iota {dimensions = array<i32: 0>} : vector<1x8x1xi32>
    %29 = tpu.iota {dimensions = array<i32: 2>} : vector<1x8x1xi32>
    %30 = arith.cmpi eq, %28, %29 : vector<1x8x1xi32>
    %31 = vector.shape_cast %30 : vector<1x8x1xi1> to vector<8x1xi1>
    %cst_13 = arith.constant 0.000000e+00 : f32
    %cst_14 = arith.constant -1.000000e+09 : f32
    %32 = vector.broadcast %cst_13 : f32 to vector<8x1xf32>
    %33 = vector.broadcast %cst_14 : f32 to vector<8x1xf32>
    %34 = arith.select %31, %32, %33 : vector<8x1xi1>, vector<8x1xf32>
    %35 = arith.truncf %34 : vector<8x1xf32> to vector<8x1xbf16>
    %36 = tpu.concatenate %14, %20, %35 in 1 : vector<8x128xbf16>, vector<8x8xbf16>, vector<8x1xbf16> -> vector<8x137xbf16>
    %37 = arith.extui %31 : vector<8x1xi1> to vector<8x1xi32>
    %38 = arith.sitofp %37 : vector<8x1xi32> to vector<8x1xf32>
    %39 = arith.truncf %38 : vector<8x1xf32> to vector<8x1xbf16>
    %40 = tpu.concatenate %16, %27, %39 in 1 : vector<8x128xbf16>, vector<8x8xbf16>, vector<8x1xbf16> -> vector<8x137xbf16>
    %cst_15 = arith.constant dense<0.000000e+00> : vector<8x8xf32>
    %41 = tpu.matmul %36, %40, %cst_15 {dimension_numbers = #tpu.dot_dimension_numbers<[1], [1], [0], [0], [0, 0, 1, 0], [], []>} : vector<8x137xbf16>, vector<8x137xbf16>, vector<8x8xf32> -> vector<8x8xf32>
    %cst_16 = arith.constant dense<0xFF800000> : vector<8xf32>
    %42 = vector.multi_reduction <maximumf>, %41, %cst_16 [1] : vector<8x8xf32> to vector<8xf32>
    %43 = vector.shape_cast %42 : vector<8xf32> to vector<8x1xf32>
    %44 = vector.broadcast %43 : vector<8x1xf32> to vector<8x8xf32>
    %45 = arith.subf %41, %44 : vector<8x8xf32>
    %46 = math.exp %45 : vector<8x8xf32>
    %cst_17 = arith.constant dense<0.000000e+00> : vector<8xf32>
    %47 = vector.multi_reduction <add>, %46, %cst_17 [1] : vector<8x8xf32> to vector<8xf32>
    %48 = vector.shape_cast %47 : vector<8xf32> to vector<8x1xf32>
    %49 = tpu.reciprocal %48 {approx = true} : vector<8x1xf32> -> vector<8x1xf32>
    %50 = vector.broadcast %49 : vector<8x1xf32> to vector<8x8xf32>
    %51 = arith.mulf %46, %50 : vector<8x8xf32>
    %52 = arith.truncf %51 : vector<8x8xf32> to vector<8x8xbf16>
    %cst_18 = arith.constant dense<0.000000e+00> : vector<8x128xf32>
    %53 = tpu.matmul %52, %18, %cst_18 {dimension_numbers = #tpu.dot_dimension_numbers<[1], [0], [0], [1], [0, 0, 1, 1], [], []>} : vector<8x8xbf16>, vector<8x128xbf16>, vector<8x128xf32> -> vector<8x128xf32>
    %54 = arith.truncf %53 : vector<8x128xf32> to vector<8x128xbf16>
    %c0_19 = arith.constant 0 : index
    %c0_20 = arith.constant 0 : index
    %55 = vector.load %arg7[%c0_19, %c0_20] : memref<128x128xbf16, #tpu.memory_space<vmem>>, vector<128x128xbf16>
    %cst_21 = arith.constant dense<0.000000e+00> : vector<8x128xf32>
    %56 = tpu.matmul %54, %55, %cst_21 {dimension_numbers = #tpu.dot_dimension_numbers<[1], [0], [0], [1], [0, 0, 1, 1], [], []>} : vector<8x128xbf16>, vector<128x128xbf16>, vector<8x128xf32> -> vector<8x128xf32>
    %57 = arith.addf %7, %56 : vector<8x128xf32>
    %58 = arith.truncf %57 : vector<8x128xf32> to vector<8x128xbf16>
    %c0_22 = arith.constant 0 : index
    %c0_23 = arith.constant 0 : index
    %59 = vector.load %arg8[%c0_22, %c0_23] : memref<128x128xbf16, #tpu.memory_space<vmem>>, vector<128x128xbf16>
    %cst_24 = arith.constant dense<0.000000e+00> : vector<8x128xf32>
    %60 = tpu.matmul %58, %59, %cst_24 {dimension_numbers = #tpu.dot_dimension_numbers<[1], [0], [0], [1], [0, 0, 1, 1], [], []>} : vector<8x128xbf16>, vector<128x128xbf16>, vector<8x128xf32> -> vector<8x128xf32>
    %c0_25 = arith.constant 0 : index
    %c0_26 = arith.constant 0 : index
    %61 = vector.load %arg9[%c0_25, %c0_26] : memref<1x128xbf16, #tpu.memory_space<vmem>>, vector<1x128xbf16>
    %62 = arith.extf %61 : vector<1x128xbf16> to vector<1x128xf32>
    %63 = vector.broadcast %62 : vector<1x128xf32> to vector<8x128xf32>
    %64 = arith.addf %60, %63 : vector<8x128xf32>
    %cst_27 = arith.constant 0.000000e+00 : f32
    %65 = vector.broadcast %cst_27 : f32 to vector<8x128xf32>
    %66 = arith.maximumf %64, %65 : vector<8x128xf32>
    %67 = arith.truncf %66 : vector<8x128xf32> to vector<8x128xbf16>
    %c0_28 = arith.constant 0 : index
    %c0_29 = arith.constant 0 : index
    %68 = vector.load %arg10[%c0_28, %c0_29] : memref<128x128xbf16, #tpu.memory_space<vmem>>, vector<128x128xbf16>
    %cst_30 = arith.constant dense<0.000000e+00> : vector<8x128xf32>
    %69 = tpu.matmul %67, %68, %cst_30 {dimension_numbers = #tpu.dot_dimension_numbers<[1], [0], [0], [1], [0, 0, 1, 1], [], []>} : vector<8x128xbf16>, vector<128x128xbf16>, vector<8x128xf32> -> vector<8x128xf32>
    %70 = arith.addf %57, %69 : vector<8x128xf32>
    %c0_31 = arith.constant 0 : index
    %c0_32 = arith.constant 0 : index
    %71 = vector.load %arg11[%c0_31, %c0_32] : memref<1x128xbf16, #tpu.memory_space<vmem>>, vector<1x128xbf16>
    %72 = arith.extf %71 : vector<1x128xbf16> to vector<1x128xf32>
    %73 = vector.broadcast %72 : vector<1x128xf32> to vector<8x128xf32>
    %74 = arith.addf %70, %73 : vector<8x128xf32>
    %c0_33 = arith.constant 0 : index
    %c0_34 = arith.constant 0 : index
    %c0_35 = arith.constant 0 : index
    %75 = vector.load %arg3[%c0_33, %c0_34, %c0_35] : memref<1x1x8xf32, #tpu.memory_space<vmem>>, vector<1x1x8xf32>
    %76 = vector.shape_cast %75 : vector<1x1x8xf32> to vector<1x8xf32>
    %77 = vector.shape_cast %74 : vector<8x128xf32> to vector<1x8x128xf32>
    %78 = vector.shape_cast %76 : vector<1x8xf32> to vector<1x8x1xf32>
    %79 = vector.broadcast %78 : vector<1x8x1xf32> to vector<1x8x128xf32>
    %80 = arith.mulf %77, %79 : vector<1x8x128xf32>
    %cst_36 = arith.constant dense<0.000000e+00> : vector<1x128xf32>
    %81 = vector.multi_reduction <add>, %80, %cst_36 [1] : vector<1x8x128xf32> to vector<1x128xf32>
    %c0_37 = arith.constant 0 : index
    %c0_38 = arith.constant 0 : index
    %c0_39 = arith.constant 0 : index
    %82 = vector.load %arg12[%c0_37, %c0_38, %c0_39] : memref<1x1x128xf32, #tpu.memory_space<vmem>>, vector<1x1x128xf32>
    %83 = vector.shape_cast %82 : vector<1x1x128xf32> to vector<1x128xf32>
    %84 = vector.shape_cast %81 : vector<1x128xf32> to vector<1x1x128xf32>
    tpu.vector_store %arg12[%c0_37, %c0_38, %c0_39], %84 {strides = array<i32>} : memref<1x1x128xf32, #tpu.memory_space<vmem>>, vector<1x1x128xf32>,
    return
  }
  func.func @transform_0(%arg0: i32) -> (i32, i32, i32) {
    %c0_i32 = arith.constant 0 : i32
    %c0_i32_0 = arith.constant 0 : i32
    %c0_i32_1 = arith.constant 0 : i32
    return %arg0, %c0_i32, %c0_i32_0 : i32, i32, i32
  }
  func.func @transform_1(%arg0: i32) -> (i32, i32, i32) {
    %c0_i32 = arith.constant 0 : i32
    %c0_i32_0 = arith.constant 0 : i32
    %c0_i32_1 = arith.constant 0 : i32
    return %arg0, %c0_i32, %c0_i32_0 : i32, i32, i32
  }
  func.func @transform_2(%arg0: i32) -> (i32, i32, i32) {
    %c0_i32 = arith.constant 0 : i32
    %c0_i32_0 = arith.constant 0 : i32
    %c0_i32_1 = arith.constant 0 : i32
    return %arg0, %c0_i32, %c0_i32_0 : i32, i32, i32
  }
  func.func @transform_3(%arg0: i32) -> (i32, i32) {
    %c0_i32 = arith.constant 0 : i32
    %c0_i32_0 = arith.constant 0 : i32
    %c0_i32_1 = arith.constant 0 : i32
    return %c0_i32, %c0_i32_0 : i32, i32
  }
  func.func @transform_4(%arg0: i32) -> (i32, i32) {
    %c0_i32 = arith.constant 0 : i32
    %c0_i32_0 = arith.constant 0 : i32
    %c0_i32_1 = arith.constant 0 : i32
    return %c0_i32, %c0_i32_0 : i32, i32
  }
  func.func @transform_5(%arg0: i32) -> (i32, i32) {
    %c0_i32 = arith.constant 0 : i32
    %c0_i32_0 = arith.constant 0 : i32
    %c0_i32_1 = arith.constant 0 : i32
    return %c0_i32, %c0_i32_0 : i32, i32
  }
  func.func @transform_6(%arg0: i32) -> (i32, i32) {
    %c0_i32 = arith.constant 0 : i32
    %c0_i32_0 = arith.constant 0 : i32
    %c0_i32_1 = arith.constant 0 : i32
    return %c0_i32, %c0_i32_0 : i32, i32
  }
  func.func @transform_7(%arg0: i32) -> (i32, i32) {
    %c0_i32 = arith.constant 0 : i32
    %c0_i32_0 = arith.constant 0 : i32
    %c0_i32_1 = arith.constant 0 : i32
    return %c0_i32, %c0_i32_0 : i32, i32
  }
  func.func @transform_8(%arg0: i32) -> (i32, i32) {
    %c0_i32 = arith.constant 0 : i32
    %c0_i32_0 = arith.constant 0 : i32
    %c0_i32_1 = arith.constant 0 : i32
    return %c0_i32, %c0_i32_0 : i32, i32
  }
  func.func @transform_9(%arg0: i32) -> (i32, i32) {
    %c0_i32 = arith.constant 0 : i32
    %c0_i32_0 = arith.constant 0 : i32
    %c0_i32_1 = arith.constant 0 : i32
    return %c0_i32, %c0_i32_0 : i32, i32
  }
  func.func @transform_10(%arg0: i32) -> (i32, i32) {
    %c0_i32 = arith.constant 0 : i32
    %c0_i32_0 = arith.constant 0 : i32
    %c0_i32_1 = arith.constant 0 : i32
    return %c0_i32, %c0_i32_0 : i32, i32
  }
  func.func @transform_11(%arg0: i32) -> (i32, i32, i32) {
    %c0_i32 = arith.constant 0 : i32
    %c0_i32_0 = arith.constant 0 : i32
    %c0_i32_1 = arith.constant 0 : i32
    return %arg0, %c0_i32, %c0_i32_0 : i32, i32, i32
  }
}

</mosaic_0001>

<bundles_post_ra>
// kernel: discriminator_forward.1
= control target key start
LH: loop header
LB: loop body
LE: loop exit
PB: predicated region body
PF: predicated region fallthrough
CT: control target
= control target key end

     0   :  { %s1406_s17 = smov 0   ;;  %s1679_s0 = inlined_call_operand.vmem [shape: bf16[2,8,4], index: 0, kind: input, shape index: {}]   ;;  %s1680_s1 = inlined_call_operand.vmem [shape: bf16[2,8,8], index: 1, kind: input, shape index: {}]   ;;  %s1681_s2 = inlined_call_operand.vmem [shape: f32[2,1,8], index: 2, kind: input, shape index: {}]   ;;  %s1682_s3 = inlined_call_operand.vmem [shape: bf16[4,128], index: 3, kind: input, shape index: {}]   ;;  %s1683_s4 = inlined_call_operand.vmem [shape: bf16[1,128], index: 4, kind: input, shape index: {}]   ;;  %s1684_s5 = inlined_call_operand.vmem [shape: bf16[128,384], index: 5, kind: input, shape index: {}]   ;;  %s1685_s6 = inlined_call_operand.vmem [shape: bf16[128,128], index: 6, kind: input, shape index: {}]   ;;  %s1686_s7 = inlined_call_operand.vmem [shape: bf16[128,128], index: 7, kind: input, shape index: {}]   ;;  %s1687_s8 = inlined_call_operand.vmem [shape: bf16[1,128], index: 8, kind: input, shape index: {}]   ;;  %s1688_s9 = inlined_call_operand.vmem [shape: bf16[128,128], index: 9, kind: input, shape index: {}]   ;;  %s1689_s10 = inlined_call_operand.vmem [shape: bf16[1,128], index: 10, kind: input, shape index: {}]   ;;  %s1690_s11 = inlined_call_operand.vmem [shape: f32[2,1,128], index: 11, kind: output, shape index: {}]  }
   0x1 LB: > { %s1063_s18 = sadd.s32 4294967295, %s1341_s17   ;;  %p1067_p0 = scmp.ge.s32.totalorder %s1341_s17, 1  ;;  %s1341_s17 = sphi %s1406_s17, %s21_s17  }
   0x2   : > { %p353_p1 = scmp.lt.s32.totalorder %s1341_s17, 3 }
   0x4   : > { %p354_p2 = pnand %p1067_p0, %p353_p1 }
   0x5   : > { %p397_p3 = scmp.lt.s32.totalorder (!%p354_p2), %s1063_s18, 1  ;;  %s1345_s24 = smov (!%p354_p2), 8  }
   0x6   : > { %357 = sbr.rel (%p354_p2) target bundleno = 1236 (0x4d4), region = 64 }
   0xb   : > { %v413_v0 = vld [vmem:[%s1682_s3] sm:$0x3]  ;;  %vm421_vm0 = vcmask 1041408   ;;  %v1157_v2 = vld [vmem:[%s1684_s5 + $0xa8] sm:$0xf]  ;;  %s1692_s18 = smov (!%p397_p3, %s1063_s18), 1 }
   0xc   : > { %v423_v1 = vsel %vm421_vm0, %v413_v0, 0  ;;  %v1291_v3 = vld [vmem:[%s1684_s5 + $0xb0] sm:$0xf0]  ;;  %v1290_v5 = vld [vmem:[%s1684_s5 + $0xac] sm:$0xf]  ;;  %s1068_s16 = sshll.u32 %s1692_s18, 2  ;;  %s410_s19 = scalar_lea.vmem %s1690_s11, %s1692_s18 }
   0xd   : > { %432 = vmatpush.bf16.msra.mxu1 %v423_v1  ;;  %v1158_v4 = vor.u32 %v1291_v3, %v1157_v2  ;;  %v1159_v6 = vld [vmem:[%s1684_s5 + $0xb4] sm:$0xf0]  ;;  %v1165_v8 = vld [vmem:[%s1684_s5 + $0xb0] sm:$0xf]  ;;  %v1292_v9 = vld [vmem:[%s1684_s5 + $0xb8] sm:$0xf0]  ;;  %s400_s25 = scalar_lea.vmem %s1679_s0, %s1068_s16  ;;  %s404_s29 = scalar_lea.vmem %s1680_s1, %s1068_s16 }
   0xe   : > { %v1162_v7 = vor.u32 %v1290_v5, %v1159_v6  ;;  %v1145_v10 = vld [vmem:[%s1684_s5 + $0x90] sm:$0xf]  ;;  %vm417_vm1 = vcmask 31744   ;;  %v1166_v11 = vor.u32 %v1292_v9, %v1165_v8  ;;  %v1288_v12 = vld [vmem:[%s1684_s5 + $0x98] sm:$0xf0]  ;;  %vm658_vm4 = vcmask 64512  }
   0xf   : > { %v1287_v13 = vld [vmem:[%s1684_s5 + $0x94] sm:$0xf]  ;;  %v1146_v14 = vor.u32 %v1288_v12, %v1145_v10  ;;  %v1147_v15 = vld [vmem:[%s1684_s5 + $0x9c] sm:$0xf0]  ;;  %v1153_v16 = vld [vmem:[%s1684_s5 + $0x98] sm:$0xf] }
  0x10   : > { %612 = vmatpush.bf16.msra.mxu2 %v1162_v7  ;;  %v1289_v17 = vld [vmem:[%s1684_s5 + $0xa0] sm:$0xf0]  ;;  %v412_v18 = vld [vmem:[%s400_s25] sm:$0xf]  ;;  %625 = vmatpush.bf16.msra.mxu3 %v1166_v11  ;;  %v1150_v19 = vor.u32 %v1287_v13, %v1147_v15  ;;  %v1133_v21 = vld [vmem:[%s1684_s5 + $0x78] sm:$0xf]  ;;  %v643_v11 = vlaneseq  ;;  %s407_s25 = scalar_lea.vmem %s1681_s2, %s1692_s18 }
  0x11   : > { %599 = vmatpush.bf16.msrb.mxu1 %v1158_v4  ;;  %v1154_v20 = vor.u32 %v1289_v17, %v1153_v16  ;;  %v1285_v22 = vld [vmem:[%s1684_s5 + $0x80] sm:$0xf0]  ;;  %v1284_v23 = vld [vmem:[%s1684_s5 + $0x7c] sm:$0xf]  ;;  %v1135_v24 = vld [vmem:[%s1684_s5 + $0x84] sm:$0xf0] }
  0x12   : > { %1070 = vmatmul.msk.bf16.vlgmr.msra.gmra.mxu1 %vm417_vm1, %v412_v18  ;;  %v1141_v25 = vld [vmem:[%s1684_s5 + $0x80] sm:$0xf]  ;;  %v1134_v26 = vor.u32 %v1285_v22, %v1133_v21  ;;  %v1286_v27 = vld [vmem:[%s1684_s5 + $0x88] sm:$0xf0]  ;;  %v1138_v28 = vor.u32 %v1284_v23, %v1135_v24  ;;  %v1281_v32 = vld [vmem:[%s1684_s5 + $0x64] sm:$0xf] }
  0x13   : > { %v1121_v29 = vld [vmem:[%s1684_s5 + $0x60] sm:$0xf]  ;;  %v1282_v30 = vld [vmem:[%s1684_s5 + $0x68] sm:$0xf0]  ;;  %v1142_v31 = vor.u32 %v1286_v27, %v1141_v25  ;;  %v1123_v33 = vld [vmem:[%s1684_s5 + $0x6c] sm:$0xf0] }
  0x14   : > { %613 = vmatpush.bf16.msra.mxu2 %v1150_v19  ;;  %626 = vmatpush.bf16.msra.mxu3 %v1154_v20  ;;  %v1129_v34 = vld [vmem:[%s1684_s5 + $0x68] sm:$0xf]  ;;  %v1283_v35 = vld [vmem:[%s1684_s5 + $0x70] sm:$0xf0]  ;;  %v1122_v36 = vor.u32 %v1282_v30, %v1121_v29  ;;  %v1126_v37 = vor.u32 %v1281_v32, %v1123_v33  ;;  %v1278_v41 = vld [vmem:[%s1684_s5 + $0x4c] sm:$0xf] }
  0x15   : > { %600 = vmatpush.bf16.msrb.mxu1 %v1146_v14  ;;  %v1109_v38 = vld [vmem:[%s1684_s5 + $0x48] sm:$0xf]  ;;  %v1279_v39 = vld [vmem:[%s1684_s5 + $0x50] sm:$0xf0]  ;;  %v1130_v40 = vor.u32 %v1283_v35, %v1129_v34  ;;  %v1111_v42 = vld [vmem:[%s1684_s5 + $0x54] sm:$0xf0] }
  0x16   : > { %v1117_v43 = vld [vmem:[%s1684_s5 + $0x50] sm:$0xf]  ;;  %v1280_v44 = vld [vmem:[%s1684_s5 + $0x58] sm:$0xf0]  ;;  %v1110_v45 = vor.u32 %v1279_v39, %v1109_v38  ;;  %v1114_v46 = vor.u32 %v1278_v41, %v1111_v42  ;;  %v1275_v50 = vld [vmem:[%s1684_s5 + $0x34] sm:$0xf] }
  0x17   : > { %v1097_v47 = vld [vmem:[%s1684_s5 + $0x30] sm:$0xf]  ;;  %v1276_v48 = vld [vmem:[%s1684_s5 + $0x38] sm:$0xf0]  ;;  %v1118_v49 = vor.u32 %v1280_v44, %v1117_v43  ;;  %v1099_v51 = vld [vmem:[%s1684_s5 + $0x3c] sm:$0xf0] }
  0x18   : > { %614 = vmatpush.bf16.msra.mxu2 %v1138_v28  ;;  %627 = vmatpush.bf16.msra.mxu3 %v1142_v31  ;;  %v1105_v52 = vld [vmem:[%s1684_s5 + $0x38] sm:$0xf]  ;;  %v1277_v53 = vld [vmem:[%s1684_s5 + $0x40] sm:$0xf0]  ;;  %v1098_v54 = vor.u32 %v1276_v48, %v1097_v47  ;;  %v1102_v55 = vor.u32 %v1275_v50, %v1099_v51  ;;  %v1272_v59 = vld [vmem:[%s1684_s5 + $0x1c] sm:$0xf] }
  0x19   : > { %601 = vmatpush.bf16.msrb.mxu1 %v1134_v26  ;;  %v1085_v56 = vld [vmem:[%s1684_s5 + $0x18] sm:$0xf]  ;;  %v1273_v57 = vld [vmem:[%s1684_s5 + $0x20] sm:$0xf0]  ;;  %v1106_v58 = vor.u32 %v1277_v53, %v1105_v52  ;;  %v1087_v60 = vld [vmem:[%s1684_s5 + $0x24] sm:$0xf0] }
  0x1a   : > { %v1093_v61 = vld [vmem:[%s1684_s5 + $0x20] sm:$0xf]  ;;  %v1274_v62 = vld [vmem:[%s1684_s5 + $0x28] sm:$0xf0]  ;;  %v1086_v63 = vor.u32 %v1273_v57, %v1085_v56  ;;  %v1090_v0 = vor.u32 %v1272_v59, %v1087_v60  ;;  %v1269_v4 = vld [vmem:[%s1684_s5 + $0x4] sm:$0xf] }
  0x1b   : > { %v1094_v1 = vor.u32 %v1274_v62, %v1093_v61  ;;  %v1073_v2 = vld [vmem:[%s1684_s5] sm:$0xf]  ;;  %v1270_v3 = vld [vmem:[%s1684_s5 + $0x8] sm:$0xf0]  ;;  %v1075_v6 = vld [vmem:[%s1684_s5 + $0xc] sm:$0xf0] }
  0x1c   : > { %615 = vmatpush.bf16.msra.mxu2 %v1126_v37  ;;  %628 = vmatpush.bf16.msra.mxu3 %v1130_v40  ;;  %v1074_v5 = vor.u32 %v1270_v3, %v1073_v2  ;;  %v1081_v7 = vld [vmem:[%s1684_s5 + $0x8] sm:$0xf]  ;;  %v1271_v8 = vld [vmem:[%s1684_s5 + $0x10] sm:$0xf0]  ;;  %v1078_v9 = vor.u32 %v1269_v4, %v1075_v6  ;;  %v646_v12 = vand.u32 127, %v643_v11  ;;  %v644_v13 = vshrl.u32 %v643_v11, 7 }
  0x1d   : > { %602 = vmatpush.bf16.msrb.mxu1 %v1122_v36  ;;  %v1082_v10 = vor.u32 %v1271_v8, %v1081_v7  ;;  %v1343_v14 = vmov 0.0   ;;  %v1344_v18 = vmov -1e+09   ;;  %v414_v22 = vld [vmem:[%s1683_s4] sm:$0x1]  ;;  %vm672_vm5 = vcmask 72704  }
  0x1e   : > { %vm651_vm2 = vcmp.eq.s32.totalorder %v646_v12, 0  ;;  %vm647_vm3 = vcmp.eq.s32.totalorder %v644_v13, %v646_v12  ;;  %1328 = vset.pattern.permute.xlu2 %v644_v13  ;;  %1329 = vset.pattern.permute.xlu0 %v644_v13  ;;  %v415_v24 = vunpack.c.l.bf16 %v414_v22  ;;  %vm718_vm6 = vcmask 1043456   ;;  %v1300_v59 = vld [vmem:[%s1685_s6 + $0x38] sm:$0xff]  ;;  %v1299_v60 = vld [vmem:[%s1685_s6 + $0x30] sm:$0xff]  ;;  %v1298_v61 = vld [vmem:[%s1685_s6 + $0x28] sm:$0xff] }
  0x1f   : > { %v1168_v15 = vsel %vm651_vm2, 1.0, %v1343_v14  ;;  %v1167_v16 = vsel %vm647_vm3, 1.0, %v1343_v14  ;;  %v652_v19 = vsel %vm651_vm2, 0.0, %v1344_v18  ;;  %v1297_v62 = vld [vmem:[%s1685_s6 + $0x20] sm:$0xff]  ;;  %v1294_v2 = vld [vmem:[%s1685_s6 + $0x8] sm:$0xff]  ;;  %v1308_v7 = vld [vmem:[%s1686_s7 + $0x38] sm:$0xff] }
  0x20   : > { %616 = vmatpush.bf16.msra.mxu2 %v1114_v46  ;;  %629 = vmatpush.bf16.msra.mxu3 %v1118_v49  ;;  %v664_v17 = vpack.c.bf16 %v1168_v15, %v1168_v15  ;;  %v653_v21 = vpack.c.bf16 %v652_v19, %v652_v19  ;;  %v416_v25 = vperm.slane %v415_v24, 0  ;;  %v650_v30 = vpack.c.bf16 %v1167_v16, %v1167_v16  ;;  %v642_v46 = vld [vmem:[%s404_s29] sm:$0xf]  ;;  %v1307_v8 = vld [vmem:[%s1686_s7 + $0x30] sm:$0xff]  ;;  %v1304_v11 = vld [vmem:[%s1686_s7 + $0x18] sm:$0xff] }
  0x21   : > { %603 = vmatpush.bf16.msrb.mxu1 %v1110_v45  ;;  %v1293_v6 = vld [vmem:[%s1685_s6] sm:$0xff]  ;;  %v1303_v12 = vld [vmem:[%s1686_s7 + $0x10] sm:$0xff]  ;;  %v1302_v13 = vld [vmem:[%s1686_s7 + $0x8] sm:$0xff] }
  0x22   : > { %v666_v20 = vperm.slane %v664_v17, 0  ;;  %v655_v23 = vperm.slane %v653_v21, 0  ;;  %v1301_v17 = vld [vmem:[%s1686_s7] sm:$0xff]  ;;  %v1316_v18 = vld [vmem:[%s1688_s9 + $0x38] sm:$0xff]  ;;  %v1315_v19 = vld [vmem:[%s1688_s9 + $0x30] sm:$0xff] }
  0x23   : > { %v1313_v21 = vld [vmem:[%s1688_s9 + $0x20] sm:$0xff]  ;;  %v1312_v22 = vld [vmem:[%s1688_s9 + $0x18] sm:$0xff] }
  0x24   : > { %617 = vmatpush.bf16.msra.mxu2 %v1102_v55  ;;  %630 = vmatpush.bf16.msra.mxu3 %v1106_v58 }
  0x25   : > { %604 = vmatpush.bf16.msrb.mxu1 %v1098_v54  ;;  %667 = vrot.lane.b32.xlu0 %v666_v20, %s1345_s24  ;;  %v1314_v20 = vld [vmem:[%s1688_s9 + $0x28] sm:$0xff] }
  0x28   : > { %618 = vmatpush.bf16.msra.mxu2 %v1090_v0  ;;  %631 = vmatpush.bf16.msra.mxu3 %v1094_v1  ;;  %v1295_v0 = vld [vmem:[%s1685_s6 + $0x10] sm:$0xff] }
  0x29   : > { %605 = vmatpush.bf16.msrb.mxu1 %v1086_v63  ;;  %v1296_v63 = vld [vmem:[%s1685_s6 + $0x18] sm:$0xff] }
  0x2c   : > { %619 = vmatpush.bf16.msra.mxu2 %v1078_v9  ;;  %632 = vmatpush.bf16.msra.mxu3 %v1082_v10  ;;  %v1306_v9 = vld [vmem:[%s1686_s7 + $0x28] sm:$0xff]  ;;  %v1305_v10 = vld [vmem:[%s1686_s7 + $0x20] sm:$0xff] }
  0x2d   : > { %606 = vmatpush.bf16.msrb.mxu1 %v1074_v5  ;;  %656 = vrot.lane.b32.xlu0 %v655_v23, %s1345_s24  ;;  %v1311_v23 = vld [vmem:[%s1688_s9 + $0x10] sm:$0xff] }
  0x30   : > { %800 = vmatpush.bf16.msrb.mxu2 %v1300_v59  ;;  %882 = vmatpush.bf16.msrb.mxu3 %v1308_v7 }
  0x34   : > { %801 = vmatpush.bf16.msrb.mxu2 %v1299_v60  ;;  %883 = vmatpush.bf16.msrb.mxu3 %v1307_v8 }
  0x38   : > { %802 = vmatpush.bf16.msrb.mxu2 %v1298_v61  ;;  %884 = vmatpush.bf16.msrb.mxu3 %v1306_v9 }
  0x3c   : > { %803 = vmatpush.bf16.msrb.mxu2 %v1297_v62  ;;  %885 = vmatpush.bf16.msrb.mxu3 %v1305_v10 }
  0x40   : > { %804 = vmatpush.bf16.msrb.mxu2 %v1296_v63  ;;  %886 = vmatpush.bf16.msrb.mxu3 %v1304_v11 }
  0x44   : > { %805 = vmatpush.bf16.msrb.mxu2 %v1295_v0  ;;  %887 = vmatpush.bf16.msrb.mxu3 %v1303_v12 }
  0x48   : > { %806 = vmatpush.bf16.msrb.mxu2 %v1294_v2  ;;  %888 = vmatpush.bf16.msrb.mxu3 %v1302_v13 }
  0x4c   : > { %807 = vmatpush.bf16.msrb.mxu2 %v1293_v6  ;;  %889 = vmatpush.bf16.msrb.mxu3 %v1301_v17 }
  0x8f   : > { %v434_v26 = vpop.f32.mrf.mxu1 }
  0x90   : > { %v1573_v27 = vadd.f32 %v434_v26, %v416_v25 }
  0x92   : > { %v438_v28 = vpack.c.bf16 %v1573_v27, %v1573_v27 }
  0x94   : > { %607 = vmatmul.bf16.vlgmr.msrb.gmra.mxu1 %v438_v28  ;;  %620 = vmatmul.bf16.vlgmr.msra.gmra.mxu2 %v438_v28 }
  0x95   : > { %633 = vmatmul.bf16.vlgmr.msra.gmra.mxu3 %v438_v28 }
  0x97   : > { %v436_v29 = vpop.f32.mrf.mxu1  ;;  %v668_v32 = vpop.permute.xlu0 %667 }
  0x98   : > { %v671_v33 = vsel %vm658_vm4, %v650_v30, %v668_v32  ;;  %v1310_v29 = vld [vmem:[%s1688_s9 + $0x8] sm:$0xff]  ;;  %v1309_v30 = vld [vmem:[%s1688_s9] sm:$0xff] }
  0x99   : > { %v675_v37 = vsel %vm672_vm5, %v671_v33, 0 }
  0x9f   : > { %v657_v45 = vpop.permute.xlu0 %656 }
  0xa0   : > { %v661_v47 = vsel %vm658_vm4, %v642_v46, %v657_v45 }
 0x111   : > { %v608_v31 = vpop.f32.mrf.mxu1 }
 0x112   : > { %v638_v40 = vmul.f32 0.17677669, %v608_v31  ;;  %v1330_v31 = vld [vmem:[%s407_s25] ss:$0 sm:$0xff] }
 0x113   : > { %985 = vperm.xlu2 %1328, %v1330_v31  }
 0x114   : > { %v639_v42 = vpack.c.bf16 %v638_v40, %v638_v40 }
 0x117   : > { %v621_v34 = vpop.f32.mrf.mxu2 }
 0x118   : > { %v634_v35 = vpop.f32.mrf.mxu3  ;;  %v640_v36 = vpack.c.bf16 %v621_v34, %v621_v34 }
 0x119   : > { %v641_v38 = vpack.c.bf16 %v634_v35, %v634_v35  ;;  %v610_v39 = vpop.f32.mrf.mxu1 }
 0x11a   : > { %684 = vmatpush.bf16.xpose.msra.mxu0 %v640_v36  ;;  %v975_v39 = vld [vmem:[%s1689_s10] sm:$0x1] }
 0x11b   : > { %v720_v41 = vsel %vm718_vm6, %v641_v38, 0  ;;  %v976_v40 = vunpack.c.l.bf16 %v975_v39 }
 0x11c   : > { %729 = vmatpush.bf16.msra.mxu1 %v720_v41 }
 0x11d   : > { %v977_v41 = vperm.slane %v976_v40, 0 }
 0x11f   : > { %v623_v43 = vpop.f32.mrf.mxu2 }
 0x120   : > { %v636_v44 = vpop.f32.mrf.mxu3 }
 0x121   : > { %685 = vmatmul.bf16.vlgmr.msra.gmra.mxu0 %v639_v42 }
 0x122   : > { %697 = vmatpush.bf16.xpose.msrb.mxu0 %v675_v37 }
 0x12a   : > { %961 = vmatpush.bf16.msra.mxu0 %v1316_v18 }
 0x12e   : > { %962 = vmatpush.bf16.msra.mxu0 %v1315_v19 }
 0x131   : > { %1169 = vmatmul.msk.bf16.vlgmr.msrb.gmra.mxu0 %vm672_vm5, %v661_v47 }
 0x132   : > { %963 = vmatpush.bf16.msra.mxu0 %v1314_v20 }
 0x136   : > { %964 = vmatpush.bf16.msra.mxu0 %v1313_v21 }
 0x13a   : > { %965 = vmatpush.bf16.msra.mxu0 %v1312_v22 }
 0x13e   : > { %966 = vmatpush.bf16.msra.mxu0 %v1311_v23 }
 0x142   : > { %967 = vmatpush.bf16.msra.mxu0 %v1310_v29 }
 0x146   : > { %968 = vmatpush.bf16.msra.mxu0 %v1309_v30 }
 0x16d   : > { %v986_v44 = vpop.permute.xlu2 %985 }
 0x19e   : > { %v686_v48 = vpop.f32.mrf.mxu0 }
 0x1a6   : > { %v688_v49 = vpop.f32.mrf.mxu0 }
 0x1ae   : > { %v699_v50 = vpop.f32.mrf.mxu0 }
 0x1af   : > { %v700_v51 = vadd.f32 %v699_v50, %v686_v48 }
 0x1b1   : > { %v703_v52 = vsel %vm658_vm4, %v700_v51, -inf }
 0x1b2   : > { %704 = vmax.xlane.f32.xlu1 %v703_v52 }
 0x1b6   : > { %v701_v53 = vpop.f32.mrf.mxu0 }
 0x225   : > { %v705_v54 = vpop.xlane.xlu1 %704 }
 0x226   : > { %v706_v55 = vsub.f32 %v700_v51, %v705_v54 }
 0x228   : > { %v707_v56 = vmul.f32 1.442695, %v706_v55 }
 0x22a   : > { %1331 = vpow2.f32 %v707_v56 }
 0x230   : > { %v1332_v57 = vpop.eup %1331 }
 0x231   : > { %v709_v58 = vsel %vm658_vm4, %v1332_v57, 0.0 }
 0x232   : > { %710 = vadd.xlane.f32.xlu1 %v709_v58 }
 0x2a5   : > { %v711_v1 = vpop.xlane.xlu1 %710 }
 0x2a6   : > { %1333 = vrcp.f32 %v711_v1 }
 0x2ac   : > { %v1334_v3 = vpop.eup %1333 }
 0x2ad   : > { %v713_v4 = vmul.f32 %v1334_v3, %v1332_v57 }
 0x2af   : > { %v714_v5 = vpack.c.bf16 %v713_v4, %v713_v4 }
 0x2b1   : > { %1170 = vmatmul.msk.bf16.vlgmr.msra.gmra.mxu1 %vm658_vm4, %v714_v5 }
 0x32e   : > { %v731_v14 = vpop.f32.mrf.mxu1 }
 0x32f   : > { %v735_v15 = vpack.c.bf16 %v731_v14, %v731_v14 }
 0x331   : > { %808 = vmatmul.bf16.vlgmr.msrb.gmra.mxu2 %v735_v15 }
 0x336   : > { %v733_v16 = vpop.f32.mrf.mxu1 }
 0x3b4   : > { %v809_v24 = vpop.f32.mrf.mxu2 }
 0x3b5   : > { %v813_v25 = vadd.f32 %v809_v24, %v1573_v27  ;;  %v831_v27 = vld [vmem:[%s1687_s8] sm:$0x1] }
 0x3b6   : > { %v832_v32 = vunpack.c.l.bf16 %v831_v27 }
 0x3b7   : > { %v814_v26 = vpack.c.bf16 %v813_v25, %v813_v25 }
 0x3b8   : > { %v833_v33 = vperm.slane %v832_v32, 0 }
 0x3b9   : > { %890 = vmatmul.bf16.vlgmr.msrb.gmra.mxu3 %v814_v26 }
 0x3bc   : > { %v811_v28 = vpop.f32.mrf.mxu2 }
 0x43c   : > { %v891_v34 = vpop.f32.mrf.mxu3 }
 0x43d   : > { %v892_v35 = vadd.f32 %v891_v34, %v833_v33 }
 0x43f   : > { %v895_v36 = vmax.f32 %v892_v35, 0.0 }
 0x441   : > { %v896_v37 = vpack.c.bf16 %v895_v36, %v895_v36 }
 0x443   : > { %969 = vmatmul.bf16.vlgmr.msra.gmra.mxu0 %v896_v37 }
 0x444   : > { %v893_v38 = vpop.f32.mrf.mxu3 }
 0x4c0   : > { %v970_v42 = vpop.f32.mrf.mxu0 }
 0x4c1   : > { %v974_v43 = vadd.f32 %v970_v42, %v813_v25 }
 0x4c3   : > { %v978_v45 = vadd.f32 %v977_v41, %v974_v43 }
 0x4c5   : > { %v987_v46 = vmul.f32 %v986_v44, %v978_v45 }
 0x4c7   : > { %v988_v47 = vrot.slane %v987_v46, 4 }
 0x4c8   : > { %v972_v48 = vpop.f32.mrf.mxu0 }
 0x4c9   : > { %v989_v49 = vadd.f32 %v988_v47, %v987_v46 }
 0x4cb   : > { %v990_v50 = vrot.slane %v989_v49, 2 }
 0x4cd   : > { %v991_v51 = vadd.f32 %v990_v50, %v989_v49 }
 0x4cf   : > { %v992_v52 = vrot.slane %v991_v51, 1 }
 0x4d1   : > { %v993_v53 = vadd.f32 %v992_v52, %v991_v51 }
 0x4d3   : > { %994 = vst [vmem:[%s410_s19] sm:$0x1] %v993_v53 }
 0x4d4 PF: > { %s21_s17 = sadd.s32 1, %s1341_s17  }
 0x4d5   : > { %p18_p4 = scmp.ge.s32.totalorder %s21_s17, 4  }
 0x4d7   :  { %20 = sbr.rel (!%p18_p4) target bundleno = 1 (0x1), region = 100 }

</bundles_post_ra>
